<compile_context>
chip_gen: v7x
topology: tpu7x:2x2x1
jax: 0.10.0
libtpu: 0.0.40
codegen_flags: <defaults>
</compile_context>

<pallas_src>
import jax
import jax.numpy as jnp
from jax import lax
from jax.experimental import pallas as pl
from jax.experimental.pallas import tpu as pltpu

EPS = 1e-5


# ----------------------------- Pallas kernel --------------------------------
def resblock_kernel(x_ref, a1_ref, g1_ref, bt1_ref,
                    a2_ref, g2_ref, bt2_ref,
                    cd_ref, ce_ref, alpha_ref,
                    out_ref, slab_ref):
    # x_ref   : (N, H, W*C)     f32   NHWC flattened to a lane-dense slab
    # aK_ref  : (3*W*C, W*C)    bf16  block-tridiagonal conv weight, kh-concat on K
    # cd_ref  : (W*C, C)        bf16  0/1 selector: reduce W blocks -> channels
    # ce_ref  : (C, W*C)        bf16  0/1 selector: broadcast channels -> W blocks
    # alpha   : (1, 1) f32 in SMEM    PReLU slope
    # slab_ref: (N, H, 3*W*C)   bf16  scratch: three H-shifted planes, lane-concat
    N, H, WC = x_ref.shape
    C = g1_ref.shape[1]
    W = WC // C
    rows = N * H
    inv_cnt = 1.0 / float(N * H * W)

    cd = cd_ref[...]
    ce = ce_ref[...]

    def stage(act):
        # act: (N, H, WC) bf16.  Write the three H-shifted planes; the
        # boundary rows (plane-0 top, plane-2 bottom) stay zero.
        slab_ref[:, 1:H, 0:WC] = act[:, 0:H - 1, :]          # kh = 0 (shift down)
        slab_ref[:, :, WC:2 * WC] = act                      # kh = 1 (identity)
        slab_ref[:, 0:H - 1, 2 * WC:3 * WC] = act[:, 1:H, :]  # kh = 2 (shift up)

    def conv(a_ref):
        # single MXU matmul: (rows, 3*WC) @ (3*WC, WC) -> f32 (rows, WC)
        lhs = slab_ref[...].reshape(rows, 3 * WC)
        return jnp.dot(lhs, a_ref[...], preferred_element_type=jnp.float32)

    def batchnorm(t, gamma, beta):
        # training-mode BN, single-pass sum / sum-of-squares (biased variance).
        s = jnp.concatenate([jnp.sum(t, axis=0, keepdims=True),
                             jnp.sum(t * t, axis=0, keepdims=True)], axis=0)
        sc = jnp.dot(s.astype(jnp.bfloat16), cd,
                     preferred_element_type=jnp.float32)          # (2, C)
        mean = sc[0:1, :] * inv_cnt
        var = jnp.maximum(sc[1:2, :] * inv_cnt - mean * mean, 0.0)
        scale = gamma * lax.rsqrt(var + EPS)
        shift = beta - mean * scale
        ss = jnp.dot(jnp.concatenate([scale, shift], axis=0).astype(jnp.bfloat16),
                     ce, preferred_element_type=jnp.float32)      # (2, WC)
        return t * ss[0:1, :] + ss[1:2, :]

    # zero only the rows the interior stores never touch (everything else is
    # overwritten by stage(); the zeros persist for the second conv as well).
    slab_ref[:, 0:1, 0:WC] = jnp.zeros((N, 1, WC), jnp.bfloat16)
    slab_ref[:, H - 1:H, 2 * WC:3 * WC] = jnp.zeros((N, 1, WC), jnp.bfloat16)

    xf = x_ref[...]                                   # resident x (also residual)

    # ---- conv1 -> BN1 -> PReLU  (conv bias dropped: cancelled by BN mean) ----
    stage(xf.astype(jnp.bfloat16))
    y = batchnorm(conv(a1_ref), g1_ref[...], bt1_ref[...])
    alpha = alpha_ref[0, 0]
    y = jnp.where(y > 0.0, y, alpha * y)

    # ---- conv2 -> BN2 -> residual add (reuse the same slab scratch) ----------
    stage(y.reshape(N, H, WC).astype(jnp.bfloat16))
    z = batchnorm(conv(a2_ref), g2_ref[...], bt2_ref[...])
    out_ref[...] = z.reshape(N, H, WC) + xf            # requires Cin == Cout


# --------------------------- wrapper / weight prep ---------------------------
def fold_conv_weight(w_hwio, width):
    """(3,3,Cin,Cout) -> (3*width*Cin, width*Cout) block-tridiagonal fold.

    Row block kh*width*Cin + wi*Cin holds W[kh, wi-wo+1] for |wi-wo| <= 1;
    the width-pad columns contribute zero and are not materialized.
    """
    kh_, kw_, cin, cout = w_hwio.shape
    blocks = []
    for kh in range(kh_):
        b = jnp.zeros((width * cin, width * cout), jnp.float32)
        for kw in range(kw_):
            e = jnp.eye(width, width, k=1 - kw, dtype=jnp.float32)
            b = b + jnp.kron(e, w_hwio[kh, kw].astype(jnp.float32))
        blocks.append(b)
    return jnp.concatenate(blocks, axis=0).astype(jnp.bfloat16)


def fold_params(params, width):
    """One-time parameter preparation (hoisted out of the per-call path).
    Conv biases are intentionally dropped: training-mode BN cancels them."""
    cout = params["g1"].shape[1]
    eye = jnp.eye(cout, dtype=jnp.float32)
    return {
        "A1": fold_conv_weight(params["w1"], width),
        "A2": fold_conv_weight(params["w2"], width),
        "g1": params["g1"], "bt1": params["bt1"],
        "g2": params["g2"], "bt2": params["bt2"],
        # exact 0/1 selectors -> bf16 is lossless
        "cd": jnp.kron(jnp.ones((width, 1), jnp.float32), eye).astype(jnp.bfloat16),
        "ce": jnp.kron(jnp.ones((1, width), jnp.float32), eye).astype(jnp.bfloat16),
        "alpha": params["alpha"],
    }


def _resblock_slab(x_slab, fp):
    """Core entry: x_slab is the lane-dense (N, H, W*C) NHWC slab."""
    N, H, WC = x_slab.shape
    rows = N * H
    C = fp["g1"].shape[1]

    vmem = pl.BlockSpec(memory_space=pltpu.MemorySpace.VMEM)
    smem = pl.BlockSpec(memory_space=pltpu.MemorySpace.SMEM)

    cost = pl.CostEstimate(
        flops=2 * (2 * rows * (3 * WC) * WC),            # two MXU convs
        transcendentals=2 * C,                            # two per-channel rsqrt
        bytes_accessed=int(2 * x_slab.size * 4            # x in, out
                           + fp["A1"].size * 2 + fp["A2"].size * 2),
    )

    return pl.pallas_call(
        resblock_kernel,
        out_shape=jax.ShapeDtypeStruct((N, H, WC), jnp.float32),
        in_specs=[vmem] * 9 + [smem],
        out_specs=vmem,
        scratch_shapes=[pltpu.VMEM((N, H, 3 * WC), jnp.bfloat16)],
        cost_estimate=cost,
    )(x_slab, fp["A1"], fp["g1"], fp["bt1"],
      fp["A2"], fp["g2"], fp["bt2"],
      fp["cd"], fp["ce"], fp["alpha"])


@jax.jit
def residual_block(x_nchw, fp):
    """NCHW shim matching the PyTorch module. A model kept in NHWC would call
    `_resblock_slab` directly and avoid both transposes."""
    N, C, H, W = x_nchw.shape
    assert C == fp["g1"].shape[1], "residual add requires in_channels == out_channels"
    x_slab = jnp.transpose(x_nchw, (0, 2, 3, 1)).reshape(N, H, W * C)
    out = _resblock_slab(x_slab, fp).reshape(N, H, W, C)
    return jnp.transpose(out, (0, 3, 1, 2))


def make_params(key, cin, cout, k=3):
    """Deterministic synthetic parameters. Conv weights stored (KH, KW, Cin, Cout)."""
    ks = jax.random.split(key, 4)
    fan_in = cin * k * k
    s = (1.0 / fan_in) ** 0.5
    w1 = jax.random.uniform(ks[0], (k, k, cin, cout), jnp.float32, -s, s)
    b1 = jax.random.uniform(ks[1], (1, cout), jnp.float32, -s, s)
    w2 = jax.random.uniform(ks[2], (k, k, cout, cout), jnp.float32, -s, s)
    b2 = jax.random.uniform(ks[3], (1, cout), jnp.float32, -s, s)
    return {
        "w1": w1, "b1": b1,
        "g1": jnp.ones((1, cout), jnp.float32), "bt1": jnp.zeros((1, cout), jnp.float32),
        "w2": w2, "b2": b2,
        "g2": jnp.ones((1, cout), jnp.float32), "bt2": jnp.zeros((1, cout), jnp.float32),
        "alpha": jnp.full((1, 1), 0.25, jnp.float32),   # PReLU(num_parameters=1)
    }


# ---------------- pure-JAX reference (for verification only) ----------------
def _conv3x3_ref(x_nhwc, w_hwio, b):
    y = lax.conv_general_dilated(
        x_nhwc, w_hwio, window_strides=(1, 1), padding=((1, 1), (1, 1)),
        dimension_numbers=("NHWC", "HWIO", "NHWC"))
    return y + b.reshape(1, 1, 1, -1)


def _bn_ref(y, gamma, beta):
    mean = jnp.mean(y, axis=(0, 1, 2), keepdims=True)
    var = jnp.mean((y - mean) ** 2, axis=(0, 1, 2), keepdims=True)
    return (y - mean) * lax.rsqrt(var + EPS) * gamma.reshape(1, 1, 1, -1) \
        + beta.reshape(1, 1, 1, -1)


def residual_block_ref(x_nchw, p):
    # keeps the conv biases -> also validates that the kernel's bias
    # elimination under training-mode BN is exact.
    x = jnp.transpose(x_nchw, (0, 2, 3, 1))
    y = _conv3x3_ref(x, p["w1"], p["b1"])
    y = _bn_ref(y, p["g1"], p["bt1"])
    y = jnp.where(y > 0, y, p["alpha"][0, 0] * y)
    z = _conv3x3_ref(y, p["w2"], p["b2"])
    z = _bn_ref(z, p["g2"], p["bt2"])
    return jnp.transpose(z + x, (0, 3, 1, 2))


if __name__ == "__main__":
    key = jax.random.PRNGKey(0)
    kx, kp = jax.random.split(key)

    # C=8, W=16 -> W*C = 128: exactly one lane-dense vreg row per (n, h).
    N, C, H, W = 2, 8, 16, 16
    x = jax.random.normal(kx, (N, C, H, W), jnp.float32)
    params = make_params(kp, cin=C, cout=C)
    folded = fold_params(params, W)          # one-time weight folding

    out = residual_block(x, folded)
    out = jax.block_until_ready(out)

    ref = residual_block_ref(x, params)
    assert out.shape == (N, C, H, W)
    max_err = float(jnp.max(jnp.abs(out - ref)))
    # bf16 MXU operands + bf16 BN-statistic reductions (f32 accumulation
    # throughout) -> ~1e-2 worst-case abs error vs the f32 reference.
    assert jnp.allclose(out, ref, atol=3e-2, rtol=3e-2), \
        f"mismatch vs JAX reference, max abs err {max_err}"

    print("KERNEL_OK")
</pallas_src>

<mosaic_0001>
module attributes {stable_mosaic.version = 11 : i64} {
  func.func @resblock_kernel(%arg0: memref<2x16x128xf32, #tpu.memory_space<vmem>>, %arg1: memref<384x128xbf16, #tpu.memory_space<vmem>>, %arg2: memref<1x8xf32, #tpu.memory_space<vmem>>, %arg3: memref<1x8xf32, #tpu.memory_space<vmem>>, %arg4: memref<384x128xbf16, #tpu.memory_space<vmem>>, %arg5: memref<1x8xf32, #tpu.memory_space<vmem>>, %arg6: memref<1x8xf32, #tpu.memory_space<vmem>>, %arg7: memref<128x8xbf16, #tpu.memory_space<vmem>>, %arg8: memref<8x128xbf16, #tpu.memory_space<vmem>>, %arg9: memref<1x1xf32, #tpu.memory_space<smem>>, %arg10: memref<2x16x128xf32, #tpu.memory_space<vmem>>, %arg11: memref<2x16x384xbf16, #tpu.memory_space<vmem>>) attributes {dimension_semantics = [], scalar_prefetch = 0 : i64, scratch_operands = 1 : i64, tpu.core_type = #tpu.core_type<tc>} {
    %c0 = arith.constant 0 : index
    %c0_0 = arith.constant 0 : index
    %0 = vector.load %arg7[%c0, %c0_0] : memref<128x8xbf16, #tpu.memory_space<vmem>>, vector<128x8xbf16>
    %c0_1 = arith.constant 0 : index
    %c0_2 = arith.constant 0 : index
    %1 = vector.load %arg8[%c0_1, %c0_2] : memref<8x128xbf16, #tpu.memory_space<vmem>>, vector<8x128xbf16>
    %cst = arith.constant 0.000000e+00 : bf16
    %2 = vector.broadcast %cst : bf16 to vector<2x1x128xbf16>
    %c0_3 = arith.constant 0 : index
    %c0_4 = arith.constant 0 : index
    %c0_5 = arith.constant 0 : index
    %3 = vector.load %arg11[%c0_3, %c0_4, %c0_5] : memref<2x16x384xbf16, #tpu.memory_space<vmem>>, vector<2x1x128xbf16>
    tpu.vector_store %arg11[%c0_3, %c0_4, %c0_5], %2 {strides = array<i32>} : memref<2x16x384xbf16, #tpu.memory_space<vmem>>, vector<2x1x128xbf16>,
    %cst_6 = arith.constant 0.000000e+00 : bf16
    %4 = vector.broadcast %cst_6 : bf16 to vector<2x1x128xbf16>
    %c0_7 = arith.constant 0 : index
    %c15 = arith.constant 15 : index
    %c256 = arith.constant 256 : index
    %5 = vector.load %arg11[%c0_7, %c15, %c256] : memref<2x16x384xbf16, #tpu.memory_space<vmem>>, vector<2x1x128xbf16>
    tpu.vector_store %arg11[%c0_7, %c15, %c256], %4 {strides = array<i32>} : memref<2x16x384xbf16, #tpu.memory_space<vmem>>, vector<2x1x128xbf16>,
    %c0_8 = arith.constant 0 : index
    %c0_9 = arith.constant 0 : index
    %c0_10 = arith.constant 0 : index
    %6 = vector.load %arg0[%c0_8, %c0_9, %c0_10] : memref<2x16x128xf32, #tpu.memory_space<vmem>>, vector<2x16x128xf32>
    %7 = arith.truncf %6 : vector<2x16x128xf32> to vector<2x16x128xbf16>
    %8 = vector.extract_strided_slice %7 {offsets = [0, 0, 0], sizes = [2, 15, 128], strides = [1, 1, 1]} : vector<2x16x128xbf16> to vector<2x15x128xbf16>
    %c0_11 = arith.constant 0 : index
    %c1 = arith.constant 1 : index
    %c0_12 = arith.constant 0 : index
    %9 = vector.load %arg11[%c0_11, %c1, %c0_12] : memref<2x16x384xbf16, #tpu.memory_space<vmem>>, vector<2x15x128xbf16>
    tpu.vector_store %arg11[%c0_11, %c1, %c0_12], %8 {strides = array<i32>} : memref<2x16x384xbf16, #tpu.memory_space<vmem>>, vector<2x15x128xbf16>,
    %c0_13 = arith.constant 0 : index
    %c0_14 = arith.constant 0 : index
    %c128 = arith.constant 128 : index
    %10 = vector.load %arg11[%c0_13, %c0_14, %c128] : memref<2x16x384xbf16, #tpu.memory_space<vmem>>, vector<2x16x128xbf16>
    tpu.vector_store %arg11[%c0_13, %c0_14, %c128], %7 {strides = array<i32>} : memref<2x16x384xbf16, #tpu.memory_space<vmem>>, vector<2x16x128xbf16>,
    %11 = vector.extract_strided_slice %7 {offsets = [0, 1, 0], sizes = [2, 15, 128], strides = [1, 1, 1]} : vector<2x16x128xbf16> to vector<2x15x128xbf16>
    %c0_15 = arith.constant 0 : index
    %c0_16 = arith.constant 0 : index
    %c256_17 = arith.constant 256 : index
    %12 = vector.load %arg11[%c0_15, %c0_16, %c256_17] : memref<2x16x384xbf16, #tpu.memory_space<vmem>>, vector<2x15x128xbf16>
    tpu.vector_store %arg11[%c0_15, %c0_16, %c256_17], %11 {strides = array<i32>} : memref<2x16x384xbf16, #tpu.memory_space<vmem>>, vector<2x15x128xbf16>,
    %c0_18 = arith.constant 0 : index
    %c0_19 = arith.constant 0 : index
    %c0_20 = arith.constant 0 : index
    %13 = vector.load %arg11[%c0_18, %c0_19, %c0_20] : memref<2x16x384xbf16, #tpu.memory_space<vmem>>, vector<2x16x384xbf16>
    %14 = vector.shape_cast %13 : vector<2x16x384xbf16> to vector<32x384xbf16>
    %c0_21 = arith.constant 0 : index
    %c0_22 = arith.constant 0 : index
    %15 = vector.load %arg1[%c0_21, %c0_22] : memref<384x128xbf16, #tpu.memory_space<vmem>>, vector<384x128xbf16>
    %cst_23 = arith.constant dense<0.000000e+00> : vector<32x128xf32>
    %16 = tpu.matmul %14, %15, %cst_23 {dimension_numbers = #tpu.dot_dimension_numbers<[1], [0], [0], [1], [0, 0, 1, 1], [], []>} : vector<32x384xbf16>, vector<384x128xbf16>, vector<32x128xf32> -> vector<32x128xf32>
    %c0_24 = arith.constant 0 : index
    %c0_25 = arith.constant 0 : index
    %17 = vector.load %arg2[%c0_24, %c0_25] : memref<1x8xf32, #tpu.memory_space<vmem>>, vector<1x8xf32>
    %c0_26 = arith.constant 0 : index
    %c0_27 = arith.constant 0 : index
    %18 = vector.load %arg3[%c0_26, %c0_27] : memref<1x8xf32, #tpu.memory_space<vmem>>, vector<1x8xf32>
    %cst_28 = arith.constant dense<0.000000e+00> : vector<128xf32>
    %19 = vector.multi_reduction <add>, %16, %cst_28 [0] : vector<32x128xf32> to vector<128xf32>
    %20 = vector.shape_cast %19 : vector<128xf32> to vector<1x128xf32>
    %21 = arith.mulf %16, %16 : vector<32x128xf32>
    %cst_29 = arith.constant dense<0.000000e+00> : vector<128xf32>
    %22 = vector.multi_reduction <add>, %21, %cst_29 [0] : vector<32x128xf32> to vector<128xf32>
    %23 = vector.shape_cast %22 : vector<128xf32> to vector<1x128xf32>
    %24 = tpu.concatenate %20, %23 in 0 : vector<1x128xf32>, vector<1x128xf32> -> vector<2x128xf32>
    %25 = arith.truncf %24 : vector<2x128xf32> to vector<2x128xbf16>
    %cst_30 = arith.constant dense<0.000000e+00> : vector<2x8xf32>
    %26 = tpu.matmul %25, %0, %cst_30 {dimension_numbers = #tpu.dot_dimension_numbers<[1], [0], [0], [1], [0, 0, 1, 1], [], []>} : vector<2x128xbf16>, vector<128x8xbf16>, vector<2x8xf32> -> vector<2x8xf32>
    %27 = vector.extract_strided_slice %26 {offsets = [0, 0], sizes = [1, 8], strides = [1, 1]} : vector<2x8xf32> to vector<1x8xf32>
    %cst_31 = arith.constant 0.001953125 : f32
    %28 = vector.broadcast %cst_31 : f32 to vector<1x8xf32>
    %29 = arith.mulf %27, %28 : vector<1x8xf32>
    %30 = vector.extract_strided_slice %26 {offsets = [1, 0], sizes = [1, 8], strides = [1, 1]} : vector<2x8xf32> to vector<1x8xf32>
    %cst_32 = arith.constant 0.001953125 : f32
    %31 = vector.broadcast %cst_32 : f32 to vector<1x8xf32>
    %32 = arith.mulf %30, %31 : vector<1x8xf32>
    %33 = arith.mulf %29, %29 : vector<1x8xf32>
    %34 = arith.subf %32, %33 : vector<1x8xf32>
    %cst_33 = arith.constant 0.000000e+00 : f32
    %35 = vector.broadcast %cst_33 : f32 to vector<1x8xf32>
    %36 = arith.maximumf %34, %35 : vector<1x8xf32>
    %cst_34 = arith.constant 9.99999974E-6 : f32
    %37 = vector.broadcast %cst_34 : f32 to vector<1x8xf32>
    %38 = arith.addf %36, %37 : vector<1x8xf32>
    %39 = math.rsqrt %38 : vector<1x8xf32>
    %40 = arith.mulf %17, %39 : vector<1x8xf32>
    %41 = arith.mulf %29, %40 : vector<1x8xf32>
    %42 = arith.subf %18, %41 : vector<1x8xf32>
    %43 = tpu.concatenate %40, %42 in 0 : vector<1x8xf32>, vector<1x8xf32> -> vector<2x8xf32>
    %44 = arith.truncf %43 : vector<2x8xf32> to vector<2x8xbf16>
    %cst_35 = arith.constant dense<0.000000e+00> : vector<2x128xf32>
    %45 = tpu.matmul %44, %1, %cst_35 {dimension_numbers = #tpu.dot_dimension_numbers<[1], [0], [0], [1], [0, 0, 1, 1], [], []>} : vector<2x8xbf16>, vector<8x128xbf16>, vector<2x128xf32> -> vector<2x128xf32>
    %46 = vector.extract_strided_slice %45 {offsets = [0, 0], sizes = [1, 128], strides = [1, 1]} : vector<2x128xf32> to vector<1x128xf32>
    %47 = vector.broadcast %46 : vector<1x128xf32> to vector<32x128xf32>
    %48 = arith.mulf %16, %47 : vector<32x128xf32>
    %49 = vector.extract_strided_slice %45 {offsets = [1, 0], sizes = [1, 128], strides = [1, 1]} : vector<2x128xf32> to vector<1x128xf32>
    %50 = vector.broadcast %49 : vector<1x128xf32> to vector<32x128xf32>
    %51 = arith.addf %48, %50 : vector<32x128xf32>
    %c0_36 = arith.constant 0 : index
    %c0_37 = arith.constant 0 : index
    %52 = memref.load %arg9[%c0_36, %c0_37] : memref<1x1xf32, #tpu.memory_space<smem>>
    %cst_38 = arith.constant 0.000000e+00 : f32
    %53 = vector.broadcast %cst_38 : f32 to vector<32x128xf32>
    %54 = arith.cmpf ogt, %51, %53 : vector<32x128xf32>
    %55 = vector.broadcast %52 : f32 to vector<32x128xf32>
    %56 = arith.mulf %55, %51 : vector<32x128xf32>
    %57 = arith.select %54, %51, %56 : vector<32x128xi1>, vector<32x128xf32>
    %58 = vector.shape_cast %57 : vector<32x128xf32> to vector<2x16x128xf32>
    %59 = arith.truncf %58 : vector<2x16x128xf32> to vector<2x16x128xbf16>
    %60 = vector.extract_strided_slice %59 {offsets = [0, 0, 0], sizes = [2, 15, 128], strides = [1, 1, 1]} : vector<2x16x128xbf16> to vector<2x15x128xbf16>
    %c0_39 = arith.constant 0 : index
    %c1_40 = arith.constant 1 : index
    %c0_41 = arith.constant 0 : index
    %61 = vector.load %arg11[%c0_39, %c1_40, %c0_41] : memref<2x16x384xbf16, #tpu.memory_space<vmem>>, vector<2x15x128xbf16>
    tpu.vector_store %arg11[%c0_39, %c1_40, %c0_41], %60 {strides = array<i32>} : memref<2x16x384xbf16, #tpu.memory_space<vmem>>, vector<2x15x128xbf16>,
    %c0_42 = arith.constant 0 : index
    %c0_43 = arith.constant 0 : index
    %c128_44 = arith.constant 128 : index
    %62 = vector.load %arg11[%c0_42, %c0_43, %c128_44] : memref<2x16x384xbf16, #tpu.memory_space<vmem>>, vector<2x16x128xbf16>
    tpu.vector_store %arg11[%c0_42, %c0_43, %c128_44], %59 {strides = array<i32>} : memref<2x16x384xbf16, #tpu.memory_space<vmem>>, vector<2x16x128xbf16>,
    %63 = vector.extract_strided_slice %59 {offsets = [0, 1, 0], sizes = [2, 15, 128], strides = [1, 1, 1]} : vector<2x16x128xbf16> to vector<2x15x128xbf16>
    %c0_45 = arith.constant 0 : index
    %c0_46 = arith.constant 0 : index
    %c256_47 = arith.constant 256 : index
    %64 = vector.load %arg11[%c0_45, %c0_46, %c256_47] : memref<2x16x384xbf16, #tpu.memory_space<vmem>>, vector<2x15x128xbf16>
    tpu.vector_store %arg11[%c0_45, %c0_46, %c256_47], %63 {strides = array<i32>} : memref<2x16x384xbf16, #tpu.memory_space<vmem>>, vector<2x15x128xbf16>,
    %c0_48 = arith.constant 0 : index
    %c0_49 = arith.constant 0 : index
    %c0_50 = arith.constant 0 : index
    %65 = vector.load %arg11[%c0_48, %c0_49, %c0_50] : memref<2x16x384xbf16, #tpu.memory_space<vmem>>, vector<2x16x384xbf16>
    %66 = vector.shape_cast %65 : vector<2x16x384xbf16> to vector<32x384xbf16>
    %c0_51 = arith.constant 0 : index
    %c0_52 = arith.constant 0 : index
    %67 = vector.load %arg4[%c0_51, %c0_52] : memref<384x128xbf16, #tpu.memory_space<vmem>>, vector<384x128xbf16>
    %cst_53 = arith.constant dense<0.000000e+00> : vector<32x128xf32>
    %68 = tpu.matmul %66, %67, %cst_53 {dimension_numbers = #tpu.dot_dimension_numbers<[1], [0], [0], [1], [0, 0, 1, 1], [], []>} : vector<32x384xbf16>, vector<384x128xbf16>, vector<32x128xf32> -> vector<32x128xf32>
    %c0_54 = arith.constant 0 : index
    %c0_55 = arith.constant 0 : index
    %69 = vector.load %arg5[%c0_54, %c0_55] : memref<1x8xf32, #tpu.memory_space<vmem>>, vector<1x8xf32>
    %c0_56 = arith.constant 0 : index
    %c0_57 = arith.constant 0 : index
    %70 = vector.load %arg6[%c0_56, %c0_57] : memref<1x8xf32, #tpu.memory_space<vmem>>, vector<1x8xf32>
    %cst_58 = arith.constant dense<0.000000e+00> : vector<128xf32>
    %71 = vector.multi_reduction <add>, %68, %cst_58 [0] : vector<32x128xf32> to vector<128xf32>
    %72 = vector.shape_cast %71 : vector<128xf32> to vector<1x128xf32>
    %73 = arith.mulf %68, %68 : vector<32x128xf32>
    %cst_59 = arith.constant dense<0.000000e+00> : vector<128xf32>
    %74 = vector.multi_reduction <add>, %73, %cst_59 [0] : vector<32x128xf32> to vector<128xf32>
    %75 = vector.shape_cast %74 : vector<128xf32> to vector<1x128xf32>
    %76 = tpu.concatenate %72, %75 in 0 : vector<1x128xf32>, vector<1x128xf32> -> vector<2x128xf32>
    %77 = arith.truncf %76 : vector<2x128xf32> to vector<2x128xbf16>
    %cst_60 = arith.constant dense<0.000000e+00> : vector<2x8xf32>
    %78 = tpu.matmul %77, %0, %cst_60 {dimension_numbers = #tpu.dot_dimension_numbers<[1], [0], [0], [1], [0, 0, 1, 1], [], []>} : vector<2x128xbf16>, vector<128x8xbf16>, vector<2x8xf32> -> vector<2x8xf32>
    %79 = vector.extract_strided_slice %78 {offsets = [0, 0], sizes = [1, 8], strides = [1, 1]} : vector<2x8xf32> to vector<1x8xf32>
    %cst_61 = arith.constant 0.001953125 : f32
    %80 = vector.broadcast %cst_61 : f32 to vector<1x8xf32>
    %81 = arith.mulf %79, %80 : vector<1x8xf32>
    %82 = vector.extract_strided_slice %78 {offsets = [1, 0], sizes = [1, 8], strides = [1, 1]} : vector<2x8xf32> to vector<1x8xf32>
    %cst_62 = arith.constant 0.001953125 : f32
    %83 = vector.broadcast %cst_62 : f32 to vector<1x8xf32>
    %84 = arith.mulf %82, %83 : vector<1x8xf32>
    %85 = arith.mulf %81, %81 : vector<1x8xf32>
    %86 = arith.subf %84, %85 : vector<1x8xf32>
    %cst_63 = arith.constant 0.000000e+00 : f32
    %87 = vector.broadcast %cst_63 : f32 to vector<1x8xf32>
    %88 = arith.maximumf %86, %87 : vector<1x8xf32>
    %cst_64 = arith.constant 9.99999974E-6 : f32
    %89 = vector.broadcast %cst_64 : f32 to vector<1x8xf32>
    %90 = arith.addf %88, %89 : vector<1x8xf32>
    %91 = math.rsqrt %90 : vector<1x8xf32>
    %92 = arith.mulf %69, %91 : vector<1x8xf32>
    %93 = arith.mulf %81, %92 : vector<1x8xf32>
    %94 = arith.subf %70, %93 : vector<1x8xf32>
    %95 = tpu.concatenate %92, %94 in 0 : vector<1x8xf32>, vector<1x8xf32> -> vector<2x8xf32>
    %96 = arith.truncf %95 : vector<2x8xf32> to vector<2x8xbf16>
    %cst_65 = arith.constant dense<0.000000e+00> : vector<2x128xf32>
    %97 = tpu.matmul %96, %1, %cst_65 {dimension_numbers = #tpu.dot_dimension_numbers<[1], [0], [0], [1], [0, 0, 1, 1], [], []>} : vector<2x8xbf16>, vector<8x128xbf16>, vector<2x128xf32> -> vector<2x128xf32>
    %98 = vector.extract_strided_slice %97 {offsets = [0, 0], sizes = [1, 128], strides = [1, 1]} : vector<2x128xf32> to vector<1x128xf32>
    %99 = vector.broadcast %98 : vector<1x128xf32> to vector<32x128xf32>
    %100 = arith.mulf %68, %99 : vector<32x128xf32>
    %101 = vector.extract_strided_slice %97 {offsets = [1, 0], sizes = [1, 128], strides = [1, 1]} : vector<2x128xf32> to vector<1x128xf32>
    %102 = vector.broadcast %101 : vector<1x128xf32> to vector<32x128xf32>
    %103 = arith.addf %100, %102 : vector<32x128xf32>
    %104 = vector.shape_cast %103 : vector<32x128xf32> to vector<2x16x128xf32>
    %105 = arith.addf %104, %6 : vector<2x16x128xf32>
    %c0_66 = arith.constant 0 : index
    %c0_67 = arith.constant 0 : index
    %c0_68 = arith.constant 0 : index
    %106 = vector.load %arg10[%c0_66, %c0_67, %c0_68] : memref<2x16x128xf32, #tpu.memory_space<vmem>>, vector<2x16x128xf32>
    tpu.vector_store %arg10[%c0_66, %c0_67, %c0_68], %105 {strides = array<i32>} : memref<2x16x128xf32, #tpu.memory_space<vmem>>, vector<2x16x128xf32>,
    return
  }
}

</mosaic_0001>

<bundles_post_ra>
// kernel: residual_block.1
= control target key start
LH: loop header
LB: loop body
LE: loop exit
PB: predicated region body
PF: predicated region fallthrough
CT: control target
= control target key end

     0   :  { %vm55_vm0 = vsmask.f32 256  ;;  %v57_v20 = vld [vmem:[#allocation2] sm:$0x1]  ;;  %vm54_vm1 = vcmask 1040384   ;;  %vm63_vm2 = vcmask 1047559   ;;  %s1927_s1 = inlined_call_operand.vmem [shape: bf16[384,128], index: 1, kind: input, shape index: {}]   ;;  %s1928_s0 = inlined_call_operand.vmem [shape: f32[2,16,128], index: 0, kind: input, shape index: {}]   ;;  %s1929_s7 = inlined_call_operand.vmem [shape: bf16[128,8], index: 7, kind: input, shape index: {}]   ;;  %s1930_s8 = inlined_call_operand.vmem [shape: bf16[8,128], index: 8, kind: input, shape index: {}]   ;;  %s1931_s4 = inlined_call_operand.vmem [shape: bf16[384,128], index: 4, kind: input, shape index: {}]   ;;  %s1932_s2 = inlined_call_operand.vmem [shape: f32[1,8], index: 2, kind: input, shape index: {}]   ;;  %s1933_s3 = inlined_call_operand.vmem [shape: f32[1,8], index: 3, kind: input, shape index: {}]   ;;  %s1934_s9 = inlined_call_operand.<no memory space> [shape: f32[1,1], index: 9, kind: input, shape index: {}]   ;;  %s1935_s5 = inlined_call_operand.vmem [shape: f32[1,8], index: 5, kind: input, shape index: {}]   ;;  %s1936_s6 = inlined_call_operand.vmem [shape: f32[1,8], index: 6, kind: input, shape index: {}]   ;;  %s1937_s10 = inlined_call_operand.vmem [shape: f32[2,16,128], index: 10, kind: output, shape index: {}]  }
   0x1   :  { %v1404_v0 = vld [vmem:[%s1927_s1 + $0x40] sm:$0xff]   ;;  %v1407_v3 = vld [vmem:[%s1927_s1 + $0x48] sm:$0xff]   ;;  %v1410_v6 = vld [vmem:[%s1927_s1 + $0x50] sm:$0xff]   ;;  %vm64_vm4 = vsmask.f32 7966  ;;  %vm94_vm5 = vcmask 1047552  }
   0x2   :  { %v1405_v1 = vld [vmem:[%s1927_s1] sm:$0xff]   ;;  %1211 = vmatprep.subr.bf16.mxu0 %v1404_v0  ;;  %v1408_v4 = vld [vmem:[%s1927_s1 + $0x8] sm:$0xff]   ;;  %v1411_v7 = vld [vmem:[%s1927_s1 + $0x10] sm:$0xff]   ;;  %vm95_vm7 = vsmask.f32 7938  ;;  %v1464_v62 = vmov 0.0  }
   0x3   :  { %v1406_v2 = vld [vmem:[%s1927_s1 + $0x80] sm:$0xff]   ;;  %1212 = vmatpush3.bf16.msra.mxu0 %v1405_v1  ;;  %v1409_v5 = vld [vmem:[%s1927_s1 + $0x88] sm:$0xff]   ;;  %v1412_v8 = vld [vmem:[%s1927_s1 + $0x90] sm:$0xff]   ;;  %vm111_vm8 = vsmask.f32 7424  ;;  %vm1465_vm11 = vmmov 0  }
   0x4   :  { %1309 = vmatprep.subr.bf16.mxu1 %v1406_v2  ;;  %1213 = vmatprep.subr.bf16.mxu0 %v1407_v3  ;;  %v1413_v9 = vld [vmem:[%s1927_s1 + $0x58] sm:$0xff]   ;;  %v1416_v12 = vld [vmem:[%s1927_s1 + $0x60] sm:$0xff]   ;;  %v1419_v15 = vld [vmem:[%s1927_s1 + $0x68] sm:$0xff]   ;;  %vm571_vm12 = vcmask 1043456   ;;  %vm567_vm13 = vcmask 64512  }
   0x5   :  { %1310 = vmatpush3.bf16.msra.mxu1 %v1406_v2  ;;  %v1414_v10 = vld [vmem:[%s1927_s1 + $0x18] sm:$0xff]   ;;  %v1418_v13 = vld [vmem:[%s1927_s1 + $0xa0] sm:$0xff]   ;;  %v1421_v16 = vld [vmem:[%s1927_s1 + $0xa8] sm:$0xff]  }
   0x6   :  { %1311 = vmatprep.subr.bf16.mxu1 %v1409_v5  ;;  %v1415_v11 = vld [vmem:[%s1927_s1 + $0x98] sm:$0xff]   ;;  %v1417_v14 = vld [vmem:[%s1927_s1 + $0x20] sm:$0xff]   ;;  %v1420_v17 = vld [vmem:[%s1927_s1 + $0x28] sm:$0xff]  }
   0x7   :  { %1214 = vmatpush3.bf16.msra.mxu0 %v1408_v4  ;;  %v1422_v18 = vld [vmem:[%s1927_s1 + $0x70] sm:$0xff]   ;;  %v1425_v22 = vld [vmem:[%s1927_s1 + $0x78] sm:$0xff]   ;;  %v1591_v23 = vld [vmem:[%s1928_s0] sm:$0xff] }
   0x8   :  { %1215 = vmatprep.subr.bf16.mxu0 %v1410_v6  ;;  %v1423_v19 = vld [vmem:[%s1927_s1 + $0x30] sm:$0xff]   ;;  %v1596_v24 = vld [vmem:[%s1928_s0 + $0x8] sm:$0xff]  ;;  %v1606_v26 = vld [vmem:[%s1928_s0 + $0x18] sm:$0xff] }
   0x9   :  { %1312 = vmatpush3.bf16.msra.mxu1 %v1409_v5  ;;  %v1424_v21 = vld [vmem:[%s1927_s1 + $0xb0] sm:$0xff]   ;;  %v76_v27 = vpack.c.bf16 %v1596_v24, %v1591_v23  ;;  %vm1612_vm3 = vmand %vm54_vm1, %vm55_vm0  ;;  %v1427_v30 = vld [vmem:[%s1927_s1 + $0xb8] sm:$0xff]  }
   0xa   :  { %1313 = vmatprep.subr.bf16.mxu1 %v1412_v8  ;;  %v1601_v25 = vld [vmem:[%s1928_s0 + $0x10] sm:$0xff]  ;;  %v58_v32 = vsel %vm1612_vm3, 0, %v57_v20  ;;  %v69_v33 = vld [vmem:[#allocation2 + $0x28] sm:$0x80]  ;;  %v1426_v34 = vld [vmem:[%s1927_s1 + $0x38] sm:$0xff]  }
   0xb   :  { %1216 = vmatpush3.bf16.msra.mxu0 %v1411_v7  ;;  %v66_v29 = vld [vmem:[#allocation2 + $0x10] sm:$0x80]  ;;  %v77_v31 = vpack.c.bf16 %v1606_v26, %v1601_v25  ;;  %v79_v35 = vshrl.u32 %v76_v27, 16  ;;  %v82_v36 = vshll.u32 %v76_v27, 16  ;;  %349 = vmatprep.mubr.bf16.mxu0 %v76_v27  ;;  %59 = vst [vmem:[#allocation2] sm:$0x1] %v58_v32  ;;  %vm65_vm6 = vmand %vm63_vm2, %vm64_vm4 }
   0xc   :  { %1217 = vmatprep.subr.bf16.mxu0 %v1413_v9  ;;  %v60_v37 = vld [vmem:[#allocation2 + $0x18] sm:$0x1]  ;;  %v67_v38 = vsel %vm65_vm6, 0, %v66_v29  ;;  %v70_v39 = vsel %vm65_vm6, 0, %v69_v33  ;;  %vm1631_vm9 = vmand %vm94_vm5, %vm95_vm7  ;;  %v1663_v61 = vld [vmem:[%s1929_s7] sm:$0xff]  }
   0xd   :  { %1314 = vmatpush3.bf16.msra.mxu1 %v1412_v8  ;;  %v89_v40 = vshll.u32 %v77_v31, 16  ;;  %v81_v41 = vrot.slane %v79_v35, 7  ;;  %68 = vst [vmem:[#allocation2 + $0x10] sm:$0x80] %v67_v38  ;;  %v105_v42 = vrot.slane %v82_v36, 1  ;;  %v86_v43 = vshrl.u32 %v77_v31, 16  ;;  %vm1636_vm10 = vmand %vm94_vm5, %vm111_vm8 }
   0xe   :  { %1315 = vmatprep.subr.bf16.mxu1 %v1415_v11  ;;  %71 = vst [vmem:[#allocation2 + $0x28] sm:$0x80] %v70_v39  ;;  %v61_v44 = vsel %vm1612_vm3, 0, %v60_v37  ;;  %v1672_v63 = vld [vmem:[%s1929_s7 + $0x8] sm:$0xff]   ;;  %v1679_v0 = vld [vmem:[%s1929_s7 + $0x10] sm:$0xff]   ;;  %v1686_v1 = vld [vmem:[%s1929_s7 + $0x18] sm:$0xff]  }
   0xf   :  { %1218 = vmatpush3.bf16.msra.mxu0 %v1414_v10  ;;  %v107_v45 = vrot.slane %v89_v40, 1  ;;  %62 = vst [vmem:[#allocation2 + $0x18] sm:$0x1] %v61_v44  ;;  %v84_v46 = vor.u32 %v82_v36, %v81_v41  ;;  %v106_v48 = vor.u32 %v105_v42, %v79_v35  ;;  %v88_v50 = vrot.slane %v86_v43, 7  ;;  %v1693_v2 = vld [vmem:[%s1929_s7 + $0x20] sm:$0xff]   ;;  %v1700_v3 = vld [vmem:[%s1929_s7 + $0x28] sm:$0xff]  }
  0x10   :  { %1219 = vmatprep.subr.bf16.mxu0 %v1416_v12  ;;  %v1707_v4 = vld [vmem:[%s1929_s7 + $0x30] sm:$0xff]   ;;  %v1714_v5 = vld [vmem:[%s1929_s7 + $0x38] sm:$0xff]  }
  0x11   :  { %1316 = vmatpush3.bf16.msra.mxu1 %v1415_v11  ;;  %v108_v49 = vor.u32 %v107_v45, %v86_v43  ;;  %v91_v58 = vor.u32 %v89_v40, %v88_v50 }
  0x12   :  { %1317 = vmatprep.subr.bf16.mxu1 %v1418_v13  ;;  %v97_v51 = vld [vmem:[#allocation2] sm:$0xff] }
  0x13   :  { %1220 = vmatpush3.bf16.msra.mxu0 %v1417_v14  ;;  %v1642_v53 = vsel %vm1631_vm9, %v84_v46, %v97_v51 }
  0x14   :  { %1221 = vmatprep.subr.bf16.mxu0 %v1419_v15  ;;  %v113_v54 = vld [vmem:[#allocation2 + $0x10] sm:$0xff] }
  0x15   :  { %1318 = vmatpush3.bf16.msra.mxu1 %v1418_v13  ;;  %v116_v55 = vld [vmem:[#allocation2 + $0x28] sm:$0xff]  ;;  %v1647_v56 = vsel %vm1636_vm10, %v106_v48, %v113_v54 }
  0x16   :  { %1319 = vmatprep.subr.bf16.mxu1 %v1421_v16  ;;  %v1651_v57 = vsel %vm1636_vm10, %v108_v49, %v116_v55  ;;  %1325 = vmatprep.mubr.bf16.mxu1 %v1647_v56  ;;  %v100_v59 = vld [vmem:[#allocation2 + $0x18] sm:$0xff] }
  0x17   :  { %1222 = vmatpush3.bf16.msra.mxu0 %v1420_v17  ;;  %v1657_v60 = vsel %vm1631_vm9, %v91_v58, %v100_v59  ;;  %v53_v59 = vld [vmem:[%s1930_s8] sm:$0xf] }
  0x18   :  { %1223 = vmatprep.subr.bf16.mxu0 %v1422_v18 }
  0x19   :  { %1320 = vmatpush3.bf16.msra.mxu1 %v1421_v16 }
  0x1a   :  { %1321 = vmatprep.subr.bf16.mxu1 %v1424_v21 }
  0x1b   :  { %1224 = vmatpush3.bf16.msra.mxu0 %v1423_v19 }
  0x1c   :  { %1225 = vmatprep.subr.bf16.mxu0 %v1425_v22 }
  0x1d   :  { %1322 = vmatpush3.bf16.msra.mxu1 %v1424_v21 }
  0x1e   :  { %1323 = vmatprep.subr.bf16.mxu1 %v1427_v30 }
  0x1f   :  { %1226 = vmatpush3.bf16.msra.mxu0 %v1426_v34 }
  0x20   :  { %1329 = vmatprep.subr.bf16.mxu0 %v1464_v62 }
  0x21   :  { %1324 = vmatpush3.bf16.msra.mxu1 %v1427_v30 }
  0x22   :  { %350 = vmatmul.mubr.bf16.vlgmr.msra.gmra.mrb[0].mxu0 %v1642_v53  ;;  %1349 = vmatprep.subr.bf16.mxu1 %v1464_v62 }
  0x23   :  { %357 = vmatprep.mubr.bf16.mxu0 %v77_v31  ;;  %1330 = vmatpush3.bf16.msra.mxu0 %v1663_v61 }
  0x24   :  { %1326 = vmatmul.mubr.bf16.vlgmr.msra.gmra.mrb[0].mxu1 %v1651_v57  ;;  %1331 = vmatprep.subr.bf16.mxu0 %v1464_v62 }
  0x25   :  { %1351 = vmatprep.mubr.msk.bf16.mxu1 %vm1465_vm11, %v1464_v62 }
  0x27   :  { %1332 = vmatpush3.bf16.msra.mxu0 %v1672_v63 }
  0x28   :  { %1333 = vmatprep.subr.bf16.mxu0 %v1464_v62 }
  0x2a   :  { %358 = vmatmul.mubr.bf16.gmra.mrb[4].mxu0 %v1657_v60 }
  0x2b   :  { %1334 = vmatpush3.bf16.msra.mxu0 %v1679_v0  ;;  %1345 = vmatprep.mubr.msk.bf16.mxu0 %vm1465_vm11, %v1464_v62 }
  0x2c   :  { %1335 = vmatprep.subr.bf16.mxu0 %v1464_v62 }
  0x2f   :  { %1336 = vmatpush3.bf16.msra.mxu0 %v1686_v1 }
  0x30   :  { %1337 = vmatprep.subr.bf16.mxu0 %v1464_v62 }
  0x33   :  { %1338 = vmatpush3.bf16.msra.mxu0 %v1693_v2 }
  0x34   :  { %1339 = vmatprep.subr.bf16.mxu0 %v1464_v62 }
  0x37   :  { %1340 = vmatpush3.bf16.msra.mxu0 %v1700_v3 }
  0x38   :  { %1341 = vmatprep.subr.bf16.mxu0 %v1464_v62 }
  0x3b   :  { %1342 = vmatpush3.bf16.msra.mxu0 %v1707_v4 }
  0x3c   :  { %1343 = vmatprep.subr.bf16.mxu0 %v1464_v62 }
  0x3f   :  { %1344 = vmatpush3.bf16.msra.mxu0 %v1714_v5 }
  0xf5   :  { %v1227_v6 = vpop.f32.mrb[0].mxu0 }
  0xf6   :  { %v1228_v7 = vpop.f32.mrb[1].mxu0 }
  0xf7   :  { %v1229_v8 = vadd.f32 %v1228_v7, %v1227_v6  ;;  %v1230_v9 = vpop.f32.mrb[2].mxu0  ;;  %v1327_v10 = vpop.f32.mrb[0].mxu1  ;;  %v1745_v6 = vsel %vm571_vm12, %v53_v59, 0  ;;  %v1436_v7 = vld [vmem:[%s1931_s4 + $0x40] sm:$0xff]   ;;  %v1446_v59 = vld [vmem:[%s1931_s4 + $0x18] sm:$0xff]  }
  0xf8   :  { %v1231_v11 = vpop.f32.mrb[3].mxu0  ;;  %v400_v13 = vpop.f32.mrb[1].mxu1  ;;  %1350 = vmatpush3.bf16.msra.mxu1 %v1745_v6 }
  0xf9   :  { %v1232_v12 = vadd.f32 %v1231_v11, %v1230_v9  ;;  %v1721_v14 = vadd.f32 %v1229_v8, %v400_v13  ;;  %v1328_v15 = vpop.f32.mrb[2].mxu1  ;;  %1260 = vmatprep.subr.bf16.mxu1 %v1436_v7  ;;  %v1438_v8 = vld [vmem:[%s1931_s4 + $0x80] sm:$0xff]   ;;  %v1447_v7 = vld [vmem:[%s1931_s4 + $0x98] sm:$0xff]  }
  0xfa   :  { %v403_v16 = vpop.f32.mrb[3].mxu1  ;;  %1355 = vmatprep.subr.bf16.mxu0 %v1438_v8 }
  0xfb   :  { %v1723_v17 = vadd.f32 %v1232_v12, %v403_v16  ;;  %v426_v28 = vmul.f32 %v1721_v14, %v1721_v14 }
  0xfd   :  { %v1233_v18 = vpop.f32.mrb[4].mxu0  ;;  %v427_v20 = vmul.f32 %v1723_v17, %v1723_v17  ;;  %v417_v29 = vadd.f32 %v1723_v17, %v1721_v14 }
  0xfe   :  { %v1234_v19 = vpop.f32.mrb[5].mxu0 }
  0xff   :  { %v1235_v21 = vadd.f32 %v1234_v19, %v1233_v18  ;;  %v1236_v22 = vpop.f32.mrb[6].mxu0  ;;  %v430_v32 = vadd.f32 %v427_v20, %v426_v28 }
 0x100   :  { %v1237_v27 = vpop.f32.mrb[7].mxu0 }
 0x101   :  { %v1731_v30 = vadd.f32 %v1327_v10, %v1235_v21  ;;  %v1238_v31 = vadd.f32 %v1237_v27, %v1236_v22  ;;  %v1466_v21 = vmov 1966171168   ;;  %v543_v27 = vlaneseq }
 0x102   :  { %v541_v22 = vunpack.c.l.s4 %v1466_v21  ;;  %v1459_v21 = vld [vmem:[%s1931_s4 + $0xb8] sm:$0xff]  }
 0x103   :  { %v418_v33 = vadd.f32 %v417_v29, %v1731_v30  ;;  %v428_v34 = vmul.f32 %v1731_v30, %v1731_v30  ;;  %v1736_v35 = vadd.f32 %v1328_v15, %v1238_v31  ;;  %v1754_v29 = vshrl.u32 %v543_v27, 7 }
 0x104   :  { %v542_v28 = vunpack.c.0.s8 %v541_v22 }
 0x105   :  { %v431_v36 = vadd.f32 %v430_v32, %v428_v34  ;;  %v419_v37 = vadd.f32 %v418_v33, %v1736_v35  ;;  %v429_v38 = vmul.f32 %v1736_v35, %v1736_v35  ;;  %v625_v22 = vsub.s32 1, %v1754_v29 }
 0x106   :  { %v1757_v31 = vsub.s32 %v542_v28, %v1754_v29 }
 0x107   :  { %v420_v39 = vrot.slane %v419_v37, 4  ;;  %v432_v40 = vadd.f32 %v431_v36, %v429_v38  ;;  %v415_v36 = vld [vmem:[%s1932_s2] sm:$0x1] }
 0x109   :  { %v421_v41 = vadd.f32 %v420_v39, %v419_v37  ;;  %v433_v42 = vrot.slane %v432_v40, 4  ;;  %v416_v39 = vld [vmem:[%s1933_s3] sm:$0x1] }
 0x10b   :  { %v422_v43 = vrot.slane %v421_v41, 2  ;;  %v434_v44 = vadd.f32 %v433_v42, %v432_v40 }
 0x10d   :  { %v423_v45 = vadd.f32 %v422_v43, %v421_v41  ;;  %v435_v46 = vrot.slane %v434_v44, 2  ;;  %v1768_v41 = vsub.s32 0, %v1754_v29 }
 0x10f   :  { %v424_v48 = vrot.slane %v423_v45, 1  ;;  %v436_v49 = vadd.f32 %v435_v46, %v434_v44 }
 0x111   :  { %v437_v50 = vrot.slane %v436_v49, 1  ;;  %v425_v51 = vadd.f32 %v424_v48, %v423_v45  ;;  %v1437_v45 = vld [vmem:[%s1931_s4] sm:$0xff]   ;;  %v1439_v48 = vld [vmem:[%s1931_s4 + $0x48] sm:$0xff]  }
 0x113   :  { %v438_v54 = vadd.f32 %v437_v50, %v436_v49  ;;  %v1440_v49 = vld [vmem:[%s1931_s4 + $0x8] sm:$0xff]  }
 0x114   :  { %v1441_v50 = vld [vmem:[%s1931_s4 + $0x88] sm:$0xff]  }
 0x115   :  { %v440_v55 = vsel %vm54_vm1, %v425_v51, %v438_v54  ;;  %v1442_v51 = vld [vmem:[%s1931_s4 + $0x50] sm:$0xff]  }
 0x116   :  { %v441_v58 = vpack.c.bf16 %v440_v55, %v440_v55  ;;  %v1443_v54 = vld [vmem:[%s1931_s4 + $0x10] sm:$0xff]  }
 0x117   :  { %v1444_v55 = vld [vmem:[%s1931_s4 + $0x90] sm:$0xff]  }
 0x118   :  { %1346 = vmatmul.mubr.bf16.vlgmr.msra.gmra.mrb[8].mxu0 %v441_v58  ;;  %v1445_v58 = vld [vmem:[%s1931_s4 + $0x58] sm:$0xff]  }
 0x119   :  { %1356 = vmatpush3.bf16.msra.mxu0 %v1438_v8  ;;  %v1448_v8 = vld [vmem:[%s1931_s4 + $0x60] sm:$0xff]  }
 0x11a   :  { %1357 = vmatprep.subr.bf16.mxu0 %v1441_v50 }
 0x11d   :  { %1358 = vmatpush3.bf16.msra.mxu0 %v1441_v50 }
 0x11e   :  { %1359 = vmatprep.subr.bf16.mxu0 %v1444_v55 }
 0x121   :  { %1360 = vmatpush3.bf16.msra.mxu0 %v1444_v55 }
 0x122   :  { %1361 = vmatprep.subr.bf16.mxu0 %v1447_v7 }
 0x125   :  { %1362 = vmatpush3.bf16.msra.mxu0 %v1447_v7 }
 0x1eb   :  { %v524_v9 = vpop.f32.mrb[8].mxu0 }
 0x1ec   :  { %v530_v10 = vmul.f32 0.001953125, %v524_v9  ;;  %v1347_v11 = vpop.f32.mrb[9].mxu0  ;;  %v1449_v9 = vld [vmem:[%s1931_s4 + $0x20] sm:$0xff]  }
 0x1ed   :  { %v527_v12 = vpop.f32.mrb[10].mxu0  ;;  %v1451_v11 = vld [vmem:[%s1931_s4 + $0x68] sm:$0xff]  }
 0x1ee   :  { %v531_v13 = vmul.f32 %v530_v10, %v530_v10  ;;  %v1348_v15 = vpop.f32.mrb[11].mxu0  ;;  %v1452_v12 = vld [vmem:[%s1931_s4 + $0x28] sm:$0xff]  }
 0x1ef   :  { %v1454_v15 = vld [vmem:[%s1931_s4 + $0x70] sm:$0xff]  }
 0x1f0   :  { %v533_v16 = vrot.slane %v531_v13, 7  ;;  %v1453_v13 = vld [vmem:[%s1931_s4 + $0xa8] sm:$0xff]  }
 0x1f2   :  { %v535_v18 = vsub.f32 %v530_v10, %v533_v16  ;;  %v1455_v16 = vld [vmem:[%s1931_s4 + $0x30] sm:$0xff]  }
 0x1f4   :  { %v536_v19 = vmax.f32 %v535_v18, 0.0  ;;  %v1456_v18 = vld [vmem:[%s1931_s4 + $0xb0] sm:$0xff]  }
 0x1f6   :  { %v537_v20 = vadd.f32 1e-05, %v536_v19  ;;  %v1457_v19 = vld [vmem:[%s1931_s4 + $0x78] sm:$0xff]  }
 0x1f8   :  { %1460 = vrsqrt.f32 %v537_v20  ;;  %v1458_v20 = vld [vmem:[%s1931_s4 + $0x38] sm:$0xff]  }
 0x202   :  { %v1461_v32 = vpop.eup %1460 }
 0x203   :  { %v546_v33 = vrot.slane %v1461_v32, %v1757_v31 }
 0x205   :  { %v547_v34 = vcombine.high %v546_v33, %v546_v33 }
 0x207   :  { %v554_v37 = vrot.slane %v547_v34, %v1757_v31 }
 0x209   :  { %v556_v38 = vmul.f32 %v554_v37, %v415_v36 }
 0x20b   :  { %v557_v40 = vmul.f32 %v556_v38, %v530_v10  ;;  %v1450_v10 = vld [vmem:[%s1931_s4 + $0xa0] sm:$0xff]  }
 0x20c   :  { %1363 = vmatprep.subr.bf16.mxu0 %v1450_v10 }
 0x20d   :  { %v558_v42 = vsub.f32 %v416_v39, %v557_v40  ;;  %1364 = vmatpush3.bf16.msra.mxu0 %v1450_v10 }
 0x20e   :  { %1365 = vmatprep.subr.bf16.mxu0 %v1453_v13 }
 0x20f   :  { %v563_v43 = vrot.slane %v558_v42, %v1768_v41  ;;  %v636_v42 = vstv %s1934_s9 }
 0x211   :  { %v565_v44 = vsel %vm54_vm1, %v556_v38, %v563_v43  ;;  %1366 = vmatpush3.bf16.msra.mxu0 %v1453_v13 }
 0x212   :  { %v566_v46 = vpack.c.bf16 %v565_v44, %v565_v44  ;;  %1367 = vmatprep.subr.bf16.mxu0 %v1456_v18 }
 0x214   :  { %1352 = vmatmul.mubr.msk.bf16.vlgmr.msra.gmra.mrb[4].mxu1 %vm567_vm13, %v566_v46 }
 0x215   :  { %1261 = vmatpush3.bf16.msra.mxu1 %v1437_v45  ;;  %1368 = vmatpush3.bf16.msra.mxu0 %v1456_v18 }
 0x216   :  { %1262 = vmatprep.subr.bf16.mxu1 %v1439_v48  ;;  %1369 = vmatprep.subr.bf16.mxu0 %v1459_v21 }
 0x219   :  { %1263 = vmatpush3.bf16.msra.mxu1 %v1440_v49  ;;  %1370 = vmatpush3.bf16.msra.mxu0 %v1459_v21 }
 0x21a   :  { %1264 = vmatprep.subr.bf16.mxu1 %v1442_v51  ;;  %1395 = vmatprep.subr.bf16.mxu0 %v1464_v62 }
 0x21d   :  { %1265 = vmatpush3.bf16.msra.mxu1 %v1443_v54 }
 0x21e   :  { %1266 = vmatprep.subr.bf16.mxu1 %v1445_v58 }
 0x221   :  { %1267 = vmatpush3.bf16.msra.mxu1 %v1446_v59 }
 0x222   :  { %1268 = vmatprep.subr.bf16.mxu1 %v1448_v8 }
 0x225   :  { %1269 = vmatpush3.bf16.msra.mxu1 %v1449_v9 }
 0x226   :  { %1270 = vmatprep.subr.bf16.mxu1 %v1451_v11 }
 0x229   :  { %1271 = vmatpush3.bf16.msra.mxu1 %v1452_v12 }
 0x22a   :  { %1272 = vmatprep.subr.bf16.mxu1 %v1454_v15 }
 0x22d   :  { %1273 = vmatpush3.bf16.msra.mxu1 %v1455_v16 }
 0x22e   :  { %1274 = vmatprep.subr.bf16.mxu1 %v1457_v19 }
 0x231   :  { %1275 = vmatpush3.bf16.msra.mxu1 %v1458_v20 }
 0x232   :  { %1375 = vmatprep.subr.bf16.mxu1 %v1464_v62 }
 0x2e7   :  { %v609_v27 = vpop.f32.mrb[4].mxu1 }
 0x2e8   :  { %v618_v28 = vrot.slane %v609_v27, %v1768_v41  ;;  %v1353_v32 = vpop.f32.mrb[5].mxu1  ;;  %v626_v33 = vrot.slane %v609_v27, %v625_v22 }
 0x2e9   :  { %v612_v34 = vpop.f32.mrb[6].mxu1 }
 0x2ea   :  { %v619_v36 = vmul.f32 %v618_v28, %v1721_v14  ;;  %v620_v37 = vmul.f32 %v618_v28, %v1723_v17  ;;  %v621_v38 = vmul.f32 %v618_v28, %v1731_v30  ;;  %v622_v39 = vmul.f32 %v618_v28, %v1736_v35  ;;  %v1354_v40 = vpop.f32.mrb[7].mxu1 }
 0x2ec   :  { %v627_v43 = vadd.f32 %v626_v33, %v619_v36  ;;  %v628_v44 = vadd.f32 %v626_v33, %v620_v37  ;;  %v629_v45 = vadd.f32 %v626_v33, %v621_v38  ;;  %v630_v46 = vadd.f32 %v626_v33, %v622_v39 }
 0x2ee   :  { %vm632_vm14 = vcmp.gt.f32.partialorder %v627_v43, 0.0  ;;  %vm633_vm15 = vcmp.gt.f32.partialorder %v628_v44, 0.0  ;;  %vm634_vm0 = vcmp.gt.f32.partialorder %v629_v45, 0.0  ;;  %vm635_vm2 = vcmp.gt.f32.partialorder %v630_v46, 0.0 }
 0x2ef   :  { %v637_v14 = vmul.f32 %v636_v42, %v627_v43  ;;  %v638_v48 = vmul.f32 %v636_v42, %v628_v44  ;;  %v639_v17 = vmul.f32 %v636_v42, %v629_v45  ;;  %v640_v49 = vmul.f32 %v636_v42, %v630_v46 }
 0x2f1   :  { %v641_v30 = vsel %vm632_vm14, %v627_v43, %v637_v14  ;;  %v642_v50 = vsel %vm633_vm15, %v628_v44, %v638_v48  ;;  %v643_v35 = vsel %vm634_vm0, %v629_v45, %v639_v17  ;;  %v644_v51 = vsel %vm635_vm2, %v630_v46, %v640_v49 }
 0x2f2   :  { %v645_v54 = vpack.c.bf16 %v642_v50, %v641_v30  ;;  %v646_v55 = vpack.c.bf16 %v644_v51, %v643_v35 }
 0x2f4   :  { %v648_v58 = vshrl.u32 %v645_v54, 16  ;;  %v651_v59 = vshll.u32 %v645_v54, 16  ;;  %v655_v7 = vshrl.u32 %v646_v55, 16  ;;  %v658_v8 = vshll.u32 %v646_v55, 16  ;;  %913 = vmatprep.mubr.bf16.mxu1 %v645_v54 }
 0x2f6   :  { %v650_v9 = vrot.slane %v648_v58, 7  ;;  %v657_v10 = vrot.slane %v655_v7, 7  ;;  %v671_v11 = vrot.slane %v651_v59, 1  ;;  %v673_v12 = vrot.slane %v658_v8, 1 }
 0x2f8   :  { %v653_v13 = vor.u32 %v651_v59, %v650_v9  ;;  %v660_v15 = vor.u32 %v658_v8, %v657_v10  ;;  %v672_v16 = vor.u32 %v671_v11, %v648_v58  ;;  %v674_v18 = vor.u32 %v673_v12, %v655_v7 }
 0x2fa   :  { %v664_v19 = vsel %vm1631_vm9, %v653_v13, %v1642_v53  ;;  %v667_v20 = vsel %vm1631_vm9, %v660_v15, %v1657_v60  ;;  %v678_v21 = vsel %vm1636_vm10, %v672_v16, %v1647_v56  ;;  %v681_v27 = vsel %vm1636_vm10, %v674_v18, %v1651_v57 }
 0x2fb   :  { %665 = vst [vmem:[#allocation2] sm:$0xff] %v664_v19  ;;  %668 = vst [vmem:[#allocation2 + $0x18] sm:$0xff] %v667_v20  ;;  %914 = vmatmul.mubr.bf16.vlgmr.msra.gmra.mrb[8].mxu1 %v664_v19  ;;  %1371 = vmatprep.mubr.bf16.mxu0 %v678_v21 }
 0x2fc   :  { %679 = vst [vmem:[#allocation2 + $0x10] sm:$0xff] %v678_v21  ;;  %682 = vst [vmem:[#allocation2 + $0x28] sm:$0xff] %v681_v27  ;;  %921 = vmatprep.mubr.bf16.mxu1 %v646_v55  ;;  %1372 = vmatmul.mubr.bf16.vlgmr.msra.gmra.mrb[12].mxu0 %v681_v27 }
 0x2fd   :  { %1376 = vmatpush3.bf16.msra.mxu1 %v1663_v61  ;;  %1396 = vmatpush3.bf16.msra.mxu0 %v1745_v6 }
 0x2fe   :  { %1377 = vmatprep.subr.bf16.mxu1 %v1464_v62  ;;  %1397 = vmatprep.mubr.msk.bf16.mxu0 %vm1465_vm11, %v1464_v62 }
 0x301   :  { %1378 = vmatpush3.bf16.msra.mxu1 %v1672_v63 }
 0x302   :  { %1379 = vmatprep.subr.bf16.mxu1 %v1464_v62 }
 0x303   :  { %922 = vmatmul.mubr.bf16.gmra.mrb[12].mxu1 %v667_v20 }
 0x304   :  { %1391 = vmatprep.mubr.msk.bf16.mxu1 %vm1465_vm11, %v1464_v62 }
 0x305   :  { %1380 = vmatpush3.bf16.msra.mxu1 %v1679_v0 }
 0x306   :  { %1381 = vmatprep.subr.bf16.mxu1 %v1464_v62 }
 0x309   :  { %1382 = vmatpush3.bf16.msra.mxu1 %v1686_v1 }
 0x30a   :  { %1383 = vmatprep.subr.bf16.mxu1 %v1464_v62 }
 0x30d   :  { %1384 = vmatpush3.bf16.msra.mxu1 %v1693_v2 }
 0x30e   :  { %1385 = vmatprep.subr.bf16.mxu1 %v1464_v62 }
 0x311   :  { %1386 = vmatpush3.bf16.msra.mxu1 %v1700_v3 }
 0x312   :  { %1387 = vmatprep.subr.bf16.mxu1 %v1464_v62 }
 0x315   :  { %1388 = vmatpush3.bf16.msra.mxu1 %v1707_v4 }
 0x316   :  { %1389 = vmatprep.subr.bf16.mxu1 %v1464_v62 }
 0x319   :  { %1390 = vmatpush3.bf16.msra.mxu1 %v1714_v5 }
 0x3ce   :  { %v1276_v47 = vpop.f32.mrb[8].mxu1 }
 0x3cf   :  { %v1277_v52 = vpop.f32.mrb[9].mxu1  ;;  %v1373_v53 = vpop.f32.mrb[12].mxu0 }
 0x3d0   :  { %v1278_v56 = vadd.f32 %v1277_v52, %v1276_v47  ;;  %v1279_v57 = vpop.f32.mrb[10].mxu1  ;;  %v964_v60 = vpop.f32.mrb[13].mxu0  ;;  %v979_v52 = vld [vmem:[%s1935_s5] sm:$0x1] }
 0x3d1   :  { %v1280_v61 = vpop.f32.mrb[11].mxu1  ;;  %v1374_v63 = vpop.f32.mrb[14].mxu0 }
 0x3d2   :  { %v1884_v0 = vadd.f32 %v1278_v56, %v964_v60  ;;  %v1281_v1 = vadd.f32 %v1280_v61, %v1279_v57  ;;  %v967_v2 = vpop.f32.mrb[15].mxu0  ;;  %v980_v57 = vld [vmem:[%s1936_s6] sm:$0x1] }
 0x3d4   :  { %v1886_v3 = vadd.f32 %v1281_v1, %v967_v2  ;;  %v990_v33 = vmul.f32 %v1884_v0, %v1884_v0 }
 0x3d6   :  { %v1282_v6 = vpop.f32.mrb[12].mxu1  ;;  %v991_v62 = vmul.f32 %v1886_v3, %v1886_v3  ;;  %v981_v34 = vadd.f32 %v1886_v3, %v1884_v0 }
 0x3d7   :  { %v1283_v4 = vpop.f32.mrb[13].mxu1 }
 0x3d8   :  { %v1284_v5 = vadd.f32 %v1283_v4, %v1282_v6  ;;  %v1285_v28 = vpop.f32.mrb[14].mxu1  ;;  %v994_v38 = vadd.f32 %v991_v62, %v990_v33 }
 0x3d9   :  { %v1286_v32 = vpop.f32.mrb[15].mxu1 }
 0x3da   :  { %v973_v36 = vadd.f32 %v1373_v53, %v1284_v5  ;;  %v1287_v37 = vadd.f32 %v1286_v32, %v1285_v28 }
 0x3dc   :  { %v982_v39 = vadd.f32 %v981_v34, %v973_v36  ;;  %v992_v40 = vmul.f32 %v973_v36, %v973_v36  ;;  %v976_v42 = vadd.f32 %v1374_v63, %v1287_v37 }
 0x3de   :  { %v995_v43 = vadd.f32 %v994_v38, %v992_v40  ;;  %v983_v44 = vadd.f32 %v982_v39, %v976_v42  ;;  %v993_v45 = vmul.f32 %v976_v42, %v976_v42 }
 0x3e0   :  { %v984_v46 = vrot.slane %v983_v44, 4  ;;  %v996_v14 = vadd.f32 %v995_v43, %v993_v45 }
 0x3e2   :  { %v985_v48 = vadd.f32 %v984_v46, %v983_v44  ;;  %v997_v17 = vrot.slane %v996_v14, 4 }
 0x3e4   :  { %v986_v49 = vrot.slane %v985_v48, 2  ;;  %v998_v30 = vadd.f32 %v997_v17, %v996_v14 }
 0x3e6   :  { %v987_v50 = vadd.f32 %v986_v49, %v985_v48  ;;  %v999_v35 = vrot.slane %v998_v30, 2 }
 0x3e8   :  { %v988_v51 = vrot.slane %v987_v50, 1  ;;  %v1000_v54 = vadd.f32 %v999_v35, %v998_v30 }
 0x3ea   :  { %v1001_v55 = vrot.slane %v1000_v54, 1  ;;  %v989_v58 = vadd.f32 %v988_v51, %v987_v50 }
 0x3ec   :  { %v1002_v59 = vadd.f32 %v1001_v55, %v1000_v54 }
 0x3ee   :  { %v1003_v7 = vsel %vm54_vm1, %v989_v58, %v1002_v59 }
 0x3ef   :  { %v1004_v8 = vpack.c.bf16 %v1003_v7, %v1003_v7 }
 0x3f1   :  { %1392 = vmatmul.mubr.bf16.vlgmr.msra.gmra.mrb[16].mxu1 %v1004_v8 }
 0x4c4   :  { %v1039_v9 = vpop.f32.mrb[16].mxu1 }
 0x4c5   :  { %v1045_v10 = vmul.f32 0.001953125, %v1039_v9  ;;  %v1393_v11 = vpop.f32.mrb[17].mxu1 }
 0x4c6   :  { %v1042_v12 = vpop.f32.mrb[18].mxu1 }
 0x4c7   :  { %v1046_v13 = vmul.f32 %v1045_v10, %v1045_v10  ;;  %v1394_v15 = vpop.f32.mrb[19].mxu1 }
 0x4c9   :  { %v1048_v16 = vrot.slane %v1046_v13, 7 }
 0x4cb   :  { %v1050_v18 = vsub.f32 %v1045_v10, %v1048_v16 }
 0x4cd   :  { %v1051_v19 = vmax.f32 %v1050_v18, 0.0 }
 0x4cf   :  { %v1052_v20 = vadd.f32 1e-05, %v1051_v19 }
 0x4d1   :  { %1462 = vrsqrt.f32 %v1052_v20 }
 0x4db   :  { %v1463_v21 = vpop.eup %1462 }
 0x4dc   :  { %v1061_v27 = vrot.slane %v1463_v21, %v1757_v31 }
 0x4de   :  { %v1062_v47 = vcombine.high %v1061_v27, %v1061_v27 }
 0x4e0   :  { %v1069_v53 = vrot.slane %v1062_v47, %v1757_v31 }
 0x4e2   :  { %v1071_v56 = vmul.f32 %v1069_v53, %v979_v52 }
 0x4e4   :  { %v1072_v60 = vmul.f32 %v1071_v56, %v1045_v10 }
 0x4e6   :  { %v1073_v61 = vsub.f32 %v980_v57, %v1072_v60 }
 0x4e8   :  { %v1078_v63 = vrot.slane %v1073_v61, %v1768_v41 }
 0x4ea   :  { %v1080_v1 = vsel %vm54_vm1, %v1071_v56, %v1078_v63 }
 0x4eb   :  { %v1081_v2 = vpack.c.bf16 %v1080_v1, %v1080_v1 }
 0x4ed   :  { %1398 = vmatmul.mubr.msk.bf16.vlgmr.msra.gmra.mrb[16].mxu0 %vm567_vm13, %v1081_v2 }
 0x5c0   :  { %v1119_v6 = vpop.f32.mrb[16].mxu0 }
 0x5c1   :  { %v1128_v4 = vrot.slane %v1119_v6, %v1768_v41  ;;  %v1399_v62 = vpop.f32.mrb[17].mxu0  ;;  %v1136_v31 = vrot.slane %v1119_v6, %v625_v22 }
 0x5c2   :  { %v1122_v5 = vpop.f32.mrb[18].mxu0 }
 0x5c3   :  { %v1129_v28 = vmul.f32 %v1128_v4, %v1884_v0  ;;  %v1130_v32 = vmul.f32 %v1128_v4, %v1886_v3  ;;  %v1131_v33 = vmul.f32 %v1128_v4, %v973_v36  ;;  %v1132_v34 = vmul.f32 %v1128_v4, %v976_v42  ;;  %v1400_v37 = vpop.f32.mrb[19].mxu0 }
 0x5c5   :  { %v1137_v38 = vadd.f32 %v1136_v31, %v1129_v28  ;;  %v1138_v39 = vadd.f32 %v1136_v31, %v1130_v32  ;;  %v1139_v40 = vadd.f32 %v1136_v31, %v1131_v33  ;;  %v1140_v43 = vadd.f32 %v1136_v31, %v1132_v34 }
 0x5c7   :  { %v1141_v44 = vadd.f32 %v1137_v38, %v1591_v23  ;;  %v1142_v41 = vadd.f32 %v1138_v39, %v1596_v24  ;;  %v1143_v45 = vadd.f32 %v1139_v40, %v1601_v25  ;;  %v1144_v29 = vadd.f32 %v1140_v43, %v1606_v26 }
 0x5c9   :  { %1145 = vst [vmem:[%s1937_s10] sm:$0xff] %v1141_v44  ;;  %1146 = vst [vmem:[%s1937_s10 + $0x8] sm:$0xff] %v1142_v41 }
 0x5ca   :  { %1147 = vst [vmem:[%s1937_s10 + $0x10] sm:$0xff] %v1143_v45  ;;  %1148 = vst [vmem:[%s1937_s10 + $0x18] sm:$0xff] %v1144_v29 }

</bundles_post_ra>
